<compile_context>
chip_gen: v7x
topology: tpu7x:2x2x1
jax: 0.10.0
libtpu: 0.0.40
codegen_flags: <defaults>
</compile_context>

<pallas_src>
import functools

import jax
import jax.numpy as jnp
from jax.experimental import pallas as pl
from jax.experimental.pallas import tpu as pltpu


# VMEM budgeting: keep double-buffered input tiles + output well inside the
# v7x per-TC 64 MiB physical VMEM (32 MiB scoped default) and under the limit
# we request explicitly below.
_TILE_BUDGET_BYTES = 24 * 1024 * 1024
_VMEM_LIMIT_BYTES = 48 * 1024 * 1024


def _round_up(x, m):
    return ((x + m - 1) // m) * m


def _choose_tiles(batch, f_in, out_pad, bpe_in, budget_bytes):
    """Pick (tm, tk, B_pad, F_pad) under a VMEM tile budget.

    Prefers tm == padded batch (weights streamed once per call), then grows tk
    as far as the budget allows; collapses to a single K step when F_in fits.
    """
    b8 = _round_up(batch, 8)
    f128 = _round_up(f_in, 128)

    def bytes_used(tm, tk):
        # double-buffered x and W tiles + output block (count 2 for safety)
        # + bias row.
        return (2 * tk * (tm + out_pad) * bpe_in
                + 2 * tm * out_pad * 4
                + 2 * out_pad * 4)

    tm = b8
    while tm > 8 and bytes_used(tm, 128) > budget_bytes:
        tm = _round_up(tm // 2, 8)

    tk_budget = (budget_bytes - 2 * tm * out_pad * 4 - 2 * out_pad * 4) // (
        2 * (tm + out_pad) * bpe_in)
    tk = max(128, (tk_budget // 128) * 128)
    if tk >= f128:
        tk = f128                      # single K step, no re-streaming
        f_pad = f128
    else:
        f_pad = _round_up(f_in, tk)

    b_pad = _round_up(batch, tm)
    return tm, tk, b_pad, f_pad


def modulenet_head_kernel(x_ref, w_ref, b_ref, o_ref, *, out_valid):
    """Fused Linear + bias + ReLU + log_softmax.

    K-tiled; accumulates directly into the resident output block (its
    index_map ignores k). Bias is the k == 0 initial value, so it is added
    exactly once; the epilogue runs in place on the last K step.
    """
    k = pl.program_id(1)

    @pl.when(k == 0)
    def _():
        o_ref[...] = jnp.broadcast_to(b_ref[...], o_ref.shape)

    # MXU matmul: bf16 inputs, f32 accumulation into the resident output.
    o_ref[...] += jnp.dot(
        x_ref[...], w_ref[...], preferred_element_type=jnp.float32
    )

    @pl.when(k == pl.num_programs(1) - 1)
    def _():
        # F.relu
        h = jnp.maximum(o_ref[...], 0.0)
        # Mask padded class columns to -inf so they do not perturb the
        # log_softmax max / sum reductions (exp(-inf) == 0).
        col = jax.lax.broadcasted_iota(jnp.int32, h.shape, dimension=1)
        h = jnp.where(col < out_valid, h, -jnp.inf)
        # log_softmax over the class axis (torch dim=1 of (B, OUT, 1) == the
        # last axis of this (tm, OUT_pad) tile).
        m = jnp.max(h, axis=-1, keepdims=True)
        z = h - m
        lse = jnp.log(jnp.sum(jnp.exp(z), axis=-1, keepdims=True))
        o_ref[...] = z - lse


def make_modulenet_head(w, b, batch_size, compute_dtype=jnp.bfloat16):
    """Build the fused head for fixed parameters and batch size.

    w: (F_in, OUT) f32 final_layer weight (already transposed to x @ w form).
    b: (OUT,) f32 bias.
    Parameter padding/casting is done here, once, and reused by every call.
    """
    F_in, OUT = w.shape
    OUT_pad = _round_up(OUT, 128)          # lane-dense class axis
    bpe_in = jnp.dtype(compute_dtype).itemsize

    tm, tk, B_pad, F_pad = _choose_tiles(
        batch_size, F_in, OUT_pad, bpe_in, _TILE_BUDGET_BYTES)

    # Pad + cast parameters ONCE (hoisted out of the per-call path). Zero
    # padding is matmul-neutral; padded class columns are masked in-kernel.
    w_p = jnp.zeros((F_pad, OUT_pad), compute_dtype).at[:F_in, :OUT].set(
        w.astype(compute_dtype))
    b_p = jnp.zeros((1, OUT_pad), jnp.float32).at[0, :OUT].set(b)

    grid = (B_pad // tm, F_pad // tk)      # reduction (K) axis last

    call = pl.pallas_call(
        functools.partial(modulenet_head_kernel, out_valid=OUT),
        out_shape=jax.ShapeDtypeStruct((B_pad, OUT_pad), jnp.float32),
        grid_spec=pltpu.PrefetchScalarGridSpec(
            num_scalar_prefetch=0,
            grid=grid,
            in_specs=[
                pl.BlockSpec((tm, tk), lambda i, k: (i, k)),        # x tile
                pl.BlockSpec((tk, OUT_pad), lambda i, k: (k, 0)),   # W tile
                pl.BlockSpec((1, OUT_pad), lambda i, k: (0, 0)),    # bias row
            ],
            out_specs=pl.BlockSpec((tm, OUT_pad), lambda i, k: (i, 0)),
        ),
        compiler_params=pltpu.CompilerParams(
            # M grid is 1 for the budgeted tm; sharding M across TensorCores
            # would only double the dominant weight HBM stream.
            dimension_semantics=("arbitrary", "arbitrary"),
            vmem_limit_bytes=_VMEM_LIMIT_BYTES,
        ),
    )

    def forward(x_nchw):
        B = x_nchw.shape[0]
        x_flat = x_nchw.reshape(B, -1).astype(compute_dtype)   # x.view(B, -1)
        if B == B_pad and F_in == F_pad:
            x_p = x_flat                   # no extra HBM copy when aligned
        else:
            x_p = jnp.zeros((B_pad, F_pad), compute_dtype)
            x_p = x_p.at[:B, :F_in].set(x_flat)
        out = call(x_p, w_p, b_p)[:B, :OUT]
        # torch: x.view(B, OUT, -1) -> (B, OUT, 1); log_softmax(dim=1); squeeze
        return jnp.squeeze(out.reshape(B, OUT, 1))

    return forward


if __name__ == "__main__":
    key = jax.random.PRNGKey(0)
    kx, kw, kb = jax.random.split(key, 3)

    B, C, H, W = 2, 4, 16, 16
    OUT = 10                               # output_dimensionality default = tensor([10])
    F_in = C * H * W

    x = jax.random.normal(kx, (B, C, H, W), dtype=jnp.float32)

    # Deterministic param init (matches torch nn.Linear default uniform bound).
    bound = 1.0 / (F_in ** 0.5)
    w = jax.random.uniform(kw, (F_in, OUT), minval=-bound, maxval=bound,
                           dtype=jnp.float32)
    b = jax.random.uniform(kb, (OUT,), minval=-bound, maxval=bound,
                           dtype=jnp.float32)

    forward = make_modulenet_head(w, b, batch_size=B)
    y = forward(x)
    jax.block_until_ready(y)

    # Pure-JAX f32 reference. Kernel uses bf16 matmul inputs with f32
    # accumulation, so the tolerance is re-baselined accordingly.
    ref = jax.nn.log_softmax(jax.nn.relu(x.reshape(B, -1) @ w + b), axis=-1)
    assert y.shape == (B, OUT)
    assert jnp.allclose(y, ref, atol=5e-2), "kernel output mismatch vs reference"

    print("KERNEL_OK")
</pallas_src>

<mosaic_0001>
module attributes {stable_mosaic.version = 11 : i64} {
  func.func @modulenet_head_kernel(%arg0: i32, %arg1: i32, %arg2: memref<8x1024xbf16, #tpu.memory_space<vmem>>, %arg3: memref<1024x128xbf16, #tpu.memory_space<vmem>>, %arg4: memref<1x128xf32, #tpu.memory_space<vmem>>, %arg5: memref<8x128xf32, #tpu.memory_space<vmem>>) attributes {dimension_semantics = [#tpu.dimension_semantics<arbitrary>, #tpu.dimension_semantics<arbitrary>], iteration_bounds = array<i64: 1, 1>, scalar_prefetch = 0 : i64, scratch_operands = 0 : i64, tpu.core_type = #tpu.core_type<tc>, window_params = [{transform_indices = @transform_0, window_bounds = array<i64: 8, 1024>}, {transform_indices = @transform_1, window_bounds = array<i64: 1024, 128>}, {pipeline_mode = #tpu.pipeline_mode<synchronous>, transform_indices = @transform_2, window_bounds = array<i64: 1, 128>}, {transform_indices = @transform_3, window_bounds = array<i64: 8, 128>}]} {
    %c0_i32 = arith.constant 0 : i32
    %0 = arith.cmpi eq, %arg1, %c0_i32 : i32
    %1 = arith.extui %0 : i1 to i32
    %c0_i32_0 = arith.constant 0 : i32
    %2 = arith.cmpi ne, %1, %c0_i32_0 : i32
    scf.if %2 {
      %c0_10 = arith.constant 0 : index
      %c0_11 = arith.constant 0 : index
      %12 = vector.load %arg4[%c0_10, %c0_11] : memref<1x128xf32, #tpu.memory_space<vmem>>, vector<1x128xf32>
      %13 = vector.shape_cast %12 : vector<1x128xf32> to vector<1x128xf32>
      %14 = vector.broadcast %13 : vector<1x128xf32> to vector<8x128xf32>
      %c0_12 = arith.constant 0 : index
      %c0_13 = arith.constant 0 : index
      %15 = vector.load %arg5[%c0_12, %c0_13] : memref<8x128xf32, #tpu.memory_space<vmem>>, vector<8x128xf32>
      tpu.vector_store %arg5[%c0_12, %c0_13], %14 {strides = array<i32>} : memref<8x128xf32, #tpu.memory_space<vmem>>, vector<8x128xf32>,
    } else {
    }
    %c0 = arith.constant 0 : index
    %c0_1 = arith.constant 0 : index
    %3 = vector.load %arg5[%c0, %c0_1] : memref<8x128xf32, #tpu.memory_space<vmem>>, vector<8x128xf32>
    %c0_2 = arith.constant 0 : index
    %c0_3 = arith.constant 0 : index
    %4 = vector.load %arg2[%c0_2, %c0_3] : memref<8x1024xbf16, #tpu.memory_space<vmem>>, vector<8x1024xbf16>
    %c0_4 = arith.constant 0 : index
    %c0_5 = arith.constant 0 : index
    %5 = vector.load %arg3[%c0_4, %c0_5] : memref<1024x128xbf16, #tpu.memory_space<vmem>>, vector<1024x128xbf16>
    %cst = arith.constant dense<0.000000e+00> : vector<8x128xf32>
    %6 = tpu.matmul %4, %5, %cst {dimension_numbers = #tpu.dot_dimension_numbers<[1], [0], [0], [1], [0, 0, 1, 1], [], []>} : vector<8x1024xbf16>, vector<1024x128xbf16>, vector<8x128xf32> -> vector<8x128xf32>
    %7 = arith.addf %3, %6 : vector<8x128xf32>
    %c0_6 = arith.constant 0 : index
    %c0_7 = arith.constant 0 : index
    %8 = vector.load %arg5[%c0_6, %c0_7] : memref<8x128xf32, #tpu.memory_space<vmem>>, vector<8x128xf32>
    tpu.vector_store %arg5[%c0_6, %c0_7], %7 {strides = array<i32>} : memref<8x128xf32, #tpu.memory_space<vmem>>, vector<8x128xf32>,
    %c0_i32_8 = arith.constant 0 : i32
    %9 = arith.cmpi eq, %arg1, %c0_i32_8 : i32
    %10 = arith.extui %9 : i1 to i32
    %c0_i32_9 = arith.constant 0 : i32
    %11 = arith.cmpi ne, %10, %c0_i32_9 : i32
    scf.if %11 {
      %c0_10 = arith.constant 0 : index
      %c0_11 = arith.constant 0 : index
      %12 = vector.load %arg5[%c0_10, %c0_11] : memref<8x128xf32, #tpu.memory_space<vmem>>, vector<8x128xf32>
      %cst_12 = arith.constant 0.000000e+00 : f32
      %13 = vector.broadcast %cst_12 : f32 to vector<8x128xf32>
      %14 = arith.maximumf %12, %13 : vector<8x128xf32>
      %15 = tpu.iota {dimensions = array<i32: 1>} : vector<8x128xi32>
      %c10_i32 = arith.constant 10 : i32
      %16 = vector.broadcast %c10_i32 : i32 to vector<8x128xi32>
      %17 = arith.cmpi slt, %15, %16 : vector<8x128xi32>
      %cst_13 = arith.constant 0xFF800000 : f32
      %18 = vector.broadcast %cst_13 : f32 to vector<8x128xf32>
      %19 = arith.select %17, %14, %18 : vector<8x128xi1>, vector<8x128xf32>
      %cst_14 = arith.constant dense<0xFF800000> : vector<8xf32>
      %20 = vector.multi_reduction <maximumf>, %19, %cst_14 [1] : vector<8x128xf32> to vector<8xf32>
      %21 = vector.shape_cast %20 : vector<8xf32> to vector<8x1xf32>
      %22 = vector.broadcast %21 : vector<8x1xf32> to vector<8x128xf32>
      %23 = arith.subf %19, %22 : vector<8x128xf32>
      %24 = math.exp %23 : vector<8x128xf32>
      %cst_15 = arith.constant dense<0.000000e+00> : vector<8xf32>
      %25 = vector.multi_reduction <add>, %24, %cst_15 [1] : vector<8x128xf32> to vector<8xf32>
      %26 = vector.shape_cast %25 : vector<8xf32> to vector<8x1xf32>
      %27 = math.log %26 : vector<8x1xf32>
      %28 = vector.broadcast %27 : vector<8x1xf32> to vector<8x128xf32>
      %29 = arith.subf %23, %28 : vector<8x128xf32>
      %c0_16 = arith.constant 0 : index
      %c0_17 = arith.constant 0 : index
      %30 = vector.load %arg5[%c0_16, %c0_17] : memref<8x128xf32, #tpu.memory_space<vmem>>, vector<8x128xf32>
      tpu.vector_store %arg5[%c0_16, %c0_17], %29 {strides = array<i32>} : memref<8x128xf32, #tpu.memory_space<vmem>>, vector<8x128xf32>,
    } else {
    }
    return
  }
  func.func @transform_0(%arg0: i32, %arg1: i32) -> (i32, i32) {
    %c0_i32 = arith.constant 0 : i32
    return %arg0, %arg1 : i32, i32
  }
  func.func @transform_1(%arg0: i32, %arg1: i32) -> (i32, i32) {
    %c0_i32 = arith.constant 0 : i32
    %c0_i32_0 = arith.constant 0 : i32
    return %arg1, %c0_i32 : i32, i32
  }
  func.func @transform_2(%arg0: i32, %arg1: i32) -> (i32, i32) {
    %c0_i32 = arith.constant 0 : i32
    %c0_i32_0 = arith.constant 0 : i32
    %c0_i32_1 = arith.constant 0 : i32
    return %c0_i32, %c0_i32_0 : i32, i32
  }
  func.func @transform_3(%arg0: i32, %arg1: i32) -> (i32, i32) {
    %c0_i32 = arith.constant 0 : i32
    %c0_i32_0 = arith.constant 0 : i32
    return %arg0, %c0_i32 : i32, i32
  }
}

</mosaic_0001>

<bundles_post_ra>
// kernel: tpu_custom_call.1
= control target key start
LH: loop header
LB: loop body
LE: loop exit
PB: predicated region body
PF: predicated region fallthrough
CT: control target
= control target key end

     0   :  { %8 = vsyncpa [#allocation3], 0  ;;  %s1182_s0 = inlined_call_operand.hbm [shape: bf16[8,1024], index: 0, kind: input, shape index: {}]   ;;  %s1183_s1 = inlined_call_operand.hbm [shape: bf16[1024,128], index: 1, kind: input, shape index: {}]   ;;  %s1184_s2 = inlined_call_operand.vmem [shape: f32[1,128], index: 2, kind: input, shape index: {}]   ;;  %s1185_s3 = inlined_call_operand.hbm [shape: f32[8,128], index: 3, kind: output, shape index: {}]  }
   0x1   :  { %9 = vsyncpa [#allocation6], 0 }
   0x2   :  { %10 = vsyncpa [#allocation4], 0  ;;  %s1111_s12 = smov [#allocation2]   ;;  %s1112_s14 = smov [#allocation5]  }
   0x3   :  { %s17_s13 = sshll.u32 %s1111_s12, 4  ;;  %s26_s15 = sshll.u32 %s1112_s14, 4  ;;  %s18_s13 = int_to_ptr.vmem [resolvable:$true] %s17_s13  ;;  %s1136_s15 = int_to_ptr.vmem [resolvable:$true] %s26_s15 }
   0x4   :  { %s1039_s18 = scalar_lea.hbm %s1182_s0, 512 }
   0x5   :  { %p1040_p0 = scmp.ne.s32.totalorder %s1182_s0, %s1039_s18  ;;  %p1043_p1 = scmp.lt.u32.totalorder %s1039_s18, %s1182_s0 }
   0x7   :  { %p1045_p2 = pnand %p1043_p1, %p1040_p0 }
   0x9   :  { %1048 = shalt.err (!%p1045_p2)
}
   0xa   :  { %s1049_s23 = scalar_lea.vmem %s18_s13, 512  ;;  %p1054_p4 = scmp.lt.s32.totalorder %s18_s13, %s18_s13 }
   0xb   :  { %p1050_p3 = scmp.ne.s32.totalorder %s18_s13, %s1049_s23  ;;  %p1055_p5 = scmp.lt.s32.totalorder %s1049_s23, %s1049_s23 }
   0xd   :  { %p1056_p6 = por %p1055_p5, %p1054_p4 }
   0xf   :  { %p1057_p7 = pnand %p1056_p6, %p1050_p3 }
  0x11   :  { %1060 = shalt.err (!%p1057_p7)
}
  0x12   :  { %20 = dma.hbm_to_vmem [thread:$0]  %s1182_s0, 512, %s18_s13, [#allocation3]  }
  0x13   :  { %s1061_s28 = scalar_lea.hbm %s1183_s1, 8192 }
  0x14   :  { %p1062_p8 = scmp.ne.s32.totalorder %s1183_s1, %s1061_s28  ;;  %p1065_p9 = scmp.lt.u32.totalorder %s1061_s28, %s1183_s1 }
  0x16   :  { %p1067_p10 = pnand %p1065_p9, %p1062_p8 }
  0x18   :  { %1070 = shalt.err (!%p1067_p10)
}
  0x19   :  { %s1071_s6 = scalar_lea.vmem %s1136_s15, 8192  ;;  %p1076_p12 = scmp.lt.s32.totalorder %s1136_s15, %s1136_s15 }
  0x1a   :  { %p1072_p11 = scmp.ne.s32.totalorder %s1136_s15, %s1071_s6  ;;  %p1077_p13 = scmp.lt.s32.totalorder %s1071_s6, %s1071_s6 }
  0x1c   :  { %p1078_p0 = por %p1077_p13, %p1076_p12 }
  0x1e   :  { %p1079_p1 = pnand %p1078_p0, %p1072_p11 }
  0x20   :  { %1082 = shalt.err (!%p1079_p1)
}
  0x21   :  { %s1113_s0 = smov 64   ;;  %s1114_s7 = smov 4  }
  0x22   :  { %32 = dma.hbm_to_vmem [thread:$0]  %s1183_s1, 8192, %s1136_s15, [#allocation6], %s1113_s0, %s1113_s0, %s1114_s7  }
  0x23   :  { %1105 = dma.done.wait [#allocation3], 512  }
  0x24   :  { %1106 = vsyncadd [#allocation3], 4294966784 }
  0x25   :  { %1107 = dma.done.wait [#allocation6], 8192  }
  0x26   :  { %1108 = vsyncadd [#allocation6], 4294959104  ;;  %v963_v0 = vld [vmem:[#allocation5 + $0x40] sm:$0xff]   ;;  %v967_v4 = vld [vmem:[#allocation5 + $0x48] sm:$0xff]   ;;  %s1115_s11 = smov [#allocation7]  }
  0x27   :  { %v964_v1 = vld [vmem:[#allocation5 + $0xc0] sm:$0xff]   ;;  %870 = vmatprep.subr.bf16.mxu0 %v963_v0  ;;  %v968_v5 = vld [vmem:[#allocation5 + $0xc8] sm:$0xff]   ;;  %v971_v8 = vld [vmem:[#allocation5 + $0x50] sm:$0xff]   ;;  %s787_s12 = sshll.u32 %s1115_s11, 4  ;;  %s788_s12 = int_to_ptr.vmem [resolvable:$true] %s787_s12 }
  0x28   :  { %v965_v2 = vld [vmem:[#allocation5] sm:$0xff]   ;;  %892 = vmatprep.subr.bf16.mxu1 %v964_v1  ;;  %v969_v6 = vld [vmem:[#allocation5 + $0x8] sm:$0xff]   ;;  %v972_v9 = vld [vmem:[#allocation5 + $0xd0] sm:$0xff]   ;;  %p1088_p3 = scmp.lt.s32.totalorder %s788_s12, %s788_s12 }
  0x29   :  { %v966_v3 = vld [vmem:[#allocation5 + $0x80] sm:$0xff]   ;;  %871 = vmatpush3.bf16.msra.mxu0 %v965_v2  ;;  %v970_v7 = vld [vmem:[#allocation5 + $0x88] sm:$0xff]   ;;  %v973_v10 = vld [vmem:[#allocation5 + $0x10] sm:$0xff]  }
  0x2a   :  { %893 = vmatpush3.bf16.msra.mxu1 %v966_v3  ;;  %872 = vmatprep.subr.bf16.mxu0 %v967_v4  ;;  %v974_v11 = vld [vmem:[#allocation5 + $0x90] sm:$0xff]   ;;  %v975_v12 = vld [vmem:[#allocation5 + $0x58] sm:$0xff]   ;;  %v979_v16 = vld [vmem:[#allocation5 + $0x60] sm:$0xff]  }
  0x2b   :  { %894 = vmatprep.subr.bf16.mxu1 %v968_v5  ;;  %v976_v13 = vld [vmem:[#allocation5 + $0xd8] sm:$0xff]   ;;  %v980_v17 = vld [vmem:[#allocation5 + $0xe0] sm:$0xff]   ;;  %v983_v20 = vld [vmem:[#allocation5 + $0x68] sm:$0xff]  }
  0x2c   :  { %v977_v14 = vld [vmem:[#allocation5 + $0x18] sm:$0xff]   ;;  %v981_v18 = vld [vmem:[#allocation5 + $0x20] sm:$0xff]   ;;  %v984_v21 = vld [vmem:[#allocation5 + $0xe8] sm:$0xff]  }
  0x2d   :  { %873 = vmatpush3.bf16.msra.mxu0 %v969_v6  ;;  %v978_v15 = vld [vmem:[#allocation5 + $0x98] sm:$0xff]   ;;  %v982_v19 = vld [vmem:[#allocation5 + $0xa0] sm:$0xff]   ;;  %v985_v22 = vld [vmem:[#allocation5 + $0x28] sm:$0xff]  }
  0x2e   :  { %895 = vmatpush3.bf16.msra.mxu1 %v970_v7  ;;  %874 = vmatprep.subr.bf16.mxu0 %v971_v8  ;;  %v986_v23 = vld [vmem:[#allocation5 + $0xa8] sm:$0xff]   ;;  %v987_v24 = vld [vmem:[#allocation5 + $0x70] sm:$0xff]   ;;  %v991_v28 = vld [vmem:[#allocation5 + $0x78] sm:$0xff]  }
  0x2f   :  { %896 = vmatprep.subr.bf16.mxu1 %v972_v9  ;;  %v988_v25 = vld [vmem:[#allocation5 + $0xf0] sm:$0xff]   ;;  %v992_v29 = vld [vmem:[#allocation5 + $0xf8] sm:$0xff]   ;;  %v55_v32 = vld [vmem:[#allocation2] sm:$0xff] }
  0x30   :  { %v989_v26 = vld [vmem:[#allocation5 + $0x30] sm:$0xff]   ;;  %v993_v30 = vld [vmem:[#allocation5 + $0x38] sm:$0xff]   ;;  %v56_v33 = vld [vmem:[#allocation2 + $0x8] sm:$0xff]  ;;  %v798_v34 = vcombine.low %v55_v32, %v55_v32  ;;  %v799_v35 = vcombine.high %v55_v32, %v55_v32 }
  0x31   :  { %875 = vmatpush3.bf16.msra.mxu0 %v973_v10  ;;  %v990_v27 = vld [vmem:[#allocation5 + $0xb0] sm:$0xff]   ;;  %v994_v31 = vld [vmem:[#allocation5 + $0xb8] sm:$0xff]   ;;  %v800_v36 = vcombine.low %v56_v33, %v56_v33  ;;  %v801_v37 = vcombine.high %v56_v33, %v56_v33  ;;  %v999_v38 = vld [vmem:[#allocation5 + $0x140] sm:$0xff]  }
  0x32   :  { %897 = vmatpush3.bf16.msra.mxu1 %v974_v11  ;;  %876 = vmatprep.subr.bf16.mxu0 %v975_v12  ;;  %v1000_v39 = vld [vmem:[#allocation5 + $0x1c0] sm:$0xff]   ;;  %v1003_v42 = vld [vmem:[#allocation5 + $0x148] sm:$0xff]   ;;  %v1007_v46 = vld [vmem:[#allocation5 + $0x150] sm:$0xff]  }
  0x33   :  { %898 = vmatprep.subr.bf16.mxu1 %v976_v13  ;;  %631 = vmatprep.mubr.bf16.mxu0 %v799_v35  ;;  %v1001_v40 = vld [vmem:[#allocation5 + $0x100] sm:$0xff]   ;;  %v1004_v43 = vld [vmem:[#allocation5 + $0x1c8] sm:$0xff]   ;;  %v1008_v47 = vld [vmem:[#allocation5 + $0x1d0] sm:$0xff]  }
  0x34   :  { %671 = vmatprep.mubr.bf16.mxu1 %v801_v37  ;;  %v1002_v41 = vld [vmem:[#allocation5 + $0x180] sm:$0xff]   ;;  %v1005_v44 = vld [vmem:[#allocation5 + $0x108] sm:$0xff]   ;;  %v1009_v48 = vld [vmem:[#allocation5 + $0x110] sm:$0xff]  }
  0x35   :  { %877 = vmatpush3.bf16.msra.mxu0 %v977_v14  ;;  %v1006_v45 = vld [vmem:[#allocation5 + $0x188] sm:$0xff]   ;;  %v1010_v49 = vld [vmem:[#allocation5 + $0x190] sm:$0xff]   ;;  %v1011_v50 = vld [vmem:[#allocation5 + $0x158] sm:$0xff]  }
  0x36   :  { %899 = vmatpush3.bf16.msra.mxu1 %v978_v15  ;;  %878 = vmatprep.subr.bf16.mxu0 %v979_v16  ;;  %v1012_v51 = vld [vmem:[#allocation5 + $0x1d8] sm:$0xff]   ;;  %v1015_v54 = vld [vmem:[#allocation5 + $0x160] sm:$0xff]   ;;  %v1019_v58 = vld [vmem:[#allocation5 + $0x168] sm:$0xff]  }
  0x37   :  { %900 = vmatprep.subr.bf16.mxu1 %v980_v17  ;;  %v1013_v52 = vld [vmem:[#allocation5 + $0x118] sm:$0xff]   ;;  %v1016_v55 = vld [vmem:[#allocation5 + $0x1e0] sm:$0xff]   ;;  %v1020_v59 = vld [vmem:[#allocation5 + $0x1e8] sm:$0xff]  }
  0x38   :  { %v1014_v53 = vld [vmem:[#allocation5 + $0x198] sm:$0xff]   ;;  %v1017_v56 = vld [vmem:[#allocation5 + $0x120] sm:$0xff]   ;;  %v1021_v60 = vld [vmem:[#allocation5 + $0x128] sm:$0xff]  }
  0x39   :  { %879 = vmatpush3.bf16.msra.mxu0 %v981_v18  ;;  %v1018_v57 = vld [vmem:[#allocation5 + $0x1a0] sm:$0xff]   ;;  %v1022_v61 = vld [vmem:[#allocation5 + $0x1a8] sm:$0xff]   ;;  %v1023_v62 = vld [vmem:[#allocation5 + $0x170] sm:$0xff]  }
  0x3a   :  { %901 = vmatpush3.bf16.msra.mxu1 %v982_v19  ;;  %880 = vmatprep.subr.bf16.mxu0 %v983_v20  ;;  %v1024_v63 = vld [vmem:[#allocation5 + $0x1f0] sm:$0xff]   ;;  %v1027_v2 = vld [vmem:[#allocation5 + $0x178] sm:$0xff]   ;;  %v797_v35 = vld [vmem:[%s1184_s2] ss:$0 sm:$0xff]  ;;  %s1083_s2 = scalar_lea.vmem %s788_s12, 128 }
  0x3b   :  { %902 = vmatprep.subr.bf16.mxu1 %v984_v21  ;;  %v1025_v0 = vld [vmem:[#allocation5 + $0x130] sm:$0xff]   ;;  %v1028_v3 = vld [vmem:[#allocation5 + $0x1f8] sm:$0xff]   ;;  %p1084_p2 = scmp.ne.s32.totalorder %s788_s12, %s1083_s2  ;;  %p1089_p4 = scmp.lt.s32.totalorder %s1083_s2, %s1083_s2 }
  0x3c   :  { %v1026_v1 = vld [vmem:[#allocation5 + $0x1b0] sm:$0xff]   ;;  %v1029_v4 = vld [vmem:[#allocation5 + $0x138] sm:$0xff]  }
  0x3d   :  { %881 = vmatpush3.bf16.msra.mxu0 %v985_v22  ;;  %v1030_v5 = vld [vmem:[#allocation5 + $0x1b8] sm:$0xff]   ;;  %v57_v6 = vld [vmem:[#allocation2 + $0x10] sm:$0xff]  ;;  %p1090_p5 = por %p1089_p4, %p1088_p3 }
  0x3e   :  { %903 = vmatpush3.bf16.msra.mxu1 %v986_v23  ;;  %882 = vmatprep.subr.bf16.mxu0 %v987_v24  ;;  %v802_v7 = vcombine.low %v57_v6, %v57_v6  ;;  %v803_v8 = vcombine.high %v57_v6, %v57_v6  ;;  %v58_v9 = vld [vmem:[#allocation2 + $0x18] sm:$0xff] }
  0x3f   :  { %904 = vmatprep.subr.bf16.mxu1 %v988_v25  ;;  %v804_v10 = vcombine.low %v58_v9, %v58_v9  ;;  %v805_v11 = vcombine.high %v58_v9, %v58_v9  ;;  %p1091_p6 = pnand %p1090_p5, %p1084_p2 }
  0x41   :  { %883 = vmatpush3.bf16.msra.mxu0 %v989_v26 }
  0x42   :  { %905 = vmatpush3.bf16.msra.mxu1 %v990_v27  ;;  %884 = vmatprep.subr.bf16.mxu0 %v991_v28  ;;  %v766_v27 = vlaneseq }
  0x43   :  { %906 = vmatprep.subr.bf16.mxu1 %v992_v29 }
  0x45   :  { %885 = vmatpush3.bf16.msra.mxu0 %v993_v30 }
  0x46   :  { %907 = vmatpush3.bf16.msra.mxu1 %v994_v31  ;;  %914 = vmatprep.subr.bf16.mxu0 %v999_v38 }
  0x47   :  { %936 = vmatprep.subr.bf16.mxu1 %v1000_v39 }
  0x48   :  { %632 = vmatmul.mubr.bf16.vlgmr.msra.gmra.mrb[0].mxu0 %v798_v34 }
  0x49   :  { %672 = vmatmul.mubr.bf16.vlgmr.msra.gmra.mrb[0].mxu1 %v800_v36  ;;  %915 = vmatpush3.bf16.msra.mxu0 %v1001_v40  ;;  %v767_v36 = vand.u32 127, %v766_v27 }
  0x4a   :  { %937 = vmatpush3.bf16.msra.mxu1 %v1002_v41  ;;  %916 = vmatprep.subr.bf16.mxu0 %v1003_v42 }
  0x4b   :  { %938 = vmatprep.subr.bf16.mxu1 %v1004_v43  ;;  %711 = vmatprep.mubr.bf16.mxu0 %v803_v8  ;;  %vm768_vm0 = vcmp.lt.s32.totalorder %v767_v36, 10 }
  0x4c   :  { %751 = vmatprep.mubr.bf16.mxu1 %v805_v11 }
  0x4d   :  { %917 = vmatpush3.bf16.msra.mxu0 %v1005_v44 }
  0x4e   :  { %939 = vmatpush3.bf16.msra.mxu1 %v1006_v45  ;;  %918 = vmatprep.subr.bf16.mxu0 %v1007_v46 }
  0x4f   :  { %940 = vmatprep.subr.bf16.mxu1 %v1008_v47 }
  0x51   :  { %919 = vmatpush3.bf16.msra.mxu0 %v1009_v48 }
  0x52   :  { %941 = vmatpush3.bf16.msra.mxu1 %v1010_v49  ;;  %920 = vmatprep.subr.bf16.mxu0 %v1011_v50 }
  0x53   :  { %942 = vmatprep.subr.bf16.mxu1 %v1012_v51 }
  0x55   :  { %921 = vmatpush3.bf16.msra.mxu0 %v1013_v52 }
  0x56   :  { %943 = vmatpush3.bf16.msra.mxu1 %v1014_v53  ;;  %922 = vmatprep.subr.bf16.mxu0 %v1015_v54 }
  0x57   :  { %944 = vmatprep.subr.bf16.mxu1 %v1016_v55 }
  0x59   :  { %923 = vmatpush3.bf16.msra.mxu0 %v1017_v56 }
  0x5a   :  { %945 = vmatpush3.bf16.msra.mxu1 %v1018_v57  ;;  %924 = vmatprep.subr.bf16.mxu0 %v1019_v58 }
  0x5b   :  { %946 = vmatprep.subr.bf16.mxu1 %v1020_v59 }
  0x5d   :  { %925 = vmatpush3.bf16.msra.mxu0 %v1021_v60 }
  0x5e   :  { %947 = vmatpush3.bf16.msra.mxu1 %v1022_v61  ;;  %926 = vmatprep.subr.bf16.mxu0 %v1023_v62 }
  0x5f   :  { %948 = vmatprep.subr.bf16.mxu1 %v1024_v63 }
  0x61   :  { %927 = vmatpush3.bf16.msra.mxu0 %v1025_v0 }
  0x62   :  { %949 = vmatpush3.bf16.msra.mxu1 %v1026_v1  ;;  %928 = vmatprep.subr.bf16.mxu0 %v1027_v2 }
  0x63   :  { %950 = vmatprep.subr.bf16.mxu1 %v1028_v3 }
  0x65   :  { %929 = vmatpush3.bf16.msra.mxu0 %v1029_v4 }
  0x66   :  { %951 = vmatpush3.bf16.msra.mxu1 %v1030_v5 }
  0x68   :  { %712 = vmatmul.mubr.bf16.vlgmr.msra.gmra.mrb[4].mxu0 %v802_v7 }
  0x69   :  { %752 = vmatmul.mubr.bf16.vlgmr.msra.gmra.mrb[4].mxu1 %v804_v10 }
 0x11b   :  { %v886_v12 = vpop.f32.mrb[0].mxu0 }
 0x11c   :  { %v908_v13 = vpop.f32.mrb[0].mxu1  ;;  %v887_v14 = vpop.f32.mrb[1].mxu0 }
 0x11d   :  { %v909_v15 = vpop.f32.mrb[1].mxu1  ;;  %v888_v16 = vadd.f32 %v887_v14, %v886_v12  ;;  %v889_v18 = vpop.f32.mrb[2].mxu0 }
 0x11e   :  { %v910_v17 = vadd.f32 %v909_v15, %v908_v13  ;;  %v911_v19 = vpop.f32.mrb[2].mxu1  ;;  %v890_v20 = vpop.f32.mrb[3].mxu0 }
 0x11f   :  { %v912_v21 = vpop.f32.mrb[3].mxu1 }
 0x120   :  { %v674_v22 = vadd.f32 %v910_v17, %v888_v16 }
 0x13b   :  { %v930_v23 = vpop.f32.mrb[4].mxu0 }
 0x13c   :  { %v952_v24 = vpop.f32.mrb[4].mxu1  ;;  %v931_v25 = vpop.f32.mrb[5].mxu0 }
 0x13d   :  { %v953_v26 = vpop.f32.mrb[5].mxu1  ;;  %v932_v28 = vadd.f32 %v931_v25, %v930_v23  ;;  %v933_v30 = vpop.f32.mrb[6].mxu0 }
 0x13e   :  { %v954_v29 = vadd.f32 %v953_v26, %v952_v24  ;;  %v955_v31 = vpop.f32.mrb[6].mxu1  ;;  %v934_v32 = vpop.f32.mrb[7].mxu0 }
 0x13f   :  { %v956_v33 = vpop.f32.mrb[7].mxu1  ;;  %v714_v34 = vadd.f32 %v932_v28, %v674_v22 }
 0x141   :  { %v754_v37 = vadd.f32 %v954_v29, %v714_v34 }
 0x143   :  { %v759_v38 = vadd.f32 %v797_v35, %v754_v37 }
 0x145   :  { %v765_v39 = vmax.f32 %v759_v38, 0.0 }
 0x147   :  { %v769_v40 = vsel %vm768_vm0, %v765_v39, -inf }
 0x148   :  { %770 = vmax.xlane.f32.xlu0 %v769_v40 }
 0x1d5   :  { %v771_v41 = vpop.xlane.xlu0 %770 }
 0x1d6   :  { %v772_v42 = vsub.f32 %v769_v40, %v771_v41 }
 0x1d8   :  { %v773_v43 = vmul.f32 1.442695, %v772_v42 }
 0x1da   :  { %1035 = vpow2.f32 %v773_v43 }
 0x1e4   :  { %v1036_v44 = vpop.eup %1035 }
 0x1e5   :  { %775 = vadd.xlane.f32.xlu0 %v1036_v44 }
 0x272   :  { %v776_v45 = vpop.xlane.xlu0 %775 }
 0x273   :  { %1037 = vlog2.f32 %v776_v45 }
 0x27d   :  { %v1038_v46 = vpop.eup %1037 }
 0x27e   :  { %v778_v47 = vmul.f32 0.6931472, %v1038_v46 }
 0x280   :  { %v779_v48 = vsub.f32 %v772_v42, %v778_v47 }
 0x282   :  { %780 = vst [vmem:[#allocation7] sm:$0xff] %v779_v48 }
 0x283   :  { %1094 = shalt.err (!%p1091_p6)
}
 0x284   :  { %s1095_s15 = scalar_lea.hbm %s1185_s3, 128 }
 0x285   :  { %p1096_p7 = scmp.ne.s32.totalorder %s1185_s3, %s1095_s15  ;;  %p1099_p8 = scmp.lt.u32.totalorder %s1095_s15, %s1185_s3 }
 0x287   :  { %p1101_p9 = pnand %p1099_p8, %p1096_p7 }
 0x289   :  { %1104 = shalt.err (!%p1101_p9)
}
 0x28a   :  { %790 = dma.vmem_to_hbm [thread:$0]  %s788_s12, 128, %s1185_s3, [#allocation4]  }
 0x28b   :  { %1109 = dma.done.wait [#allocation4], 128  }
 0x28c   :  { %1110 = vsyncadd [#allocation4], 4294967168 }
 0x28d   :  { %794 = vsyncpa [#allocation3], 1 }
 0x28e   :  { %795 = vsyncpa [#allocation6], 1 }
 0x28f   :  { %796 = vsyncpa [#allocation4], 1 }

</bundles_post_ra>
